<compile_context>
chip_gen: v6e
topology: v6e:2x2x1
jax: 0.10.0
libtpu: 0.0.40
codegen_flags: <defaults>
</compile_context>

<pallas_src>
import functools

import jax
import jax.numpy as jnp
from jax.experimental import pallas as pl
from jax.experimental.pallas import tpu as pltpu

# logical (PyTorch) feature sizes and lane-aligned padded sizes
D_IN, D_HID, D_OUT = 100, 200, 784
D_IN_P, D_HID_P, D_OUT_P = 128, 256, 896   # multiples of 128 (lane width)

LN_EPS = 1e-5
LEAKY_SLOPE = 0.02


def _round_up(n, m):
    return ((n + m - 1) // m) * m


def _bf16_epilogue_ok():
    """bf16 VPU/EUP exists on v6e/v7x; keep f32 elementwise math on v5e/older."""
    try:
        kind = jax.devices()[0].device_kind.lower()
    except Exception:
        return False
    return ("v6" in kind) or ("v7" in kind) or ("7x" in kind)


def generator_kernel(x_ref, w1_ref, b1_ref, w2_ref, b2_ref, o_ref, *, epilogue_dtype):
    # ---- Linear(100 -> 200), padded 128 -> 256, bf16 MXU / f32 accumulation ----
    h = jnp.dot(x_ref[...], w1_ref[...], preferred_element_type=jnp.float32)
    h = h + b1_ref[...]

    # ---- LeakyReLU(0.02) (f32 VPU) ----
    h = jnp.where(h > 0, h, LEAKY_SLOPE * h)

    # ---- LayerNorm statistics over the 200 real features (no lane mask) ----
    # Pad lanes of h are exactly 0 (zero pad cols of w1, zero pad of b1,
    # LeakyReLU(0)=0), so the unmasked sums already equal the real-lane sums.
    inv_n = jnp.float32(1.0 / D_HID)
    mean = jnp.sum(h, axis=-1, keepdims=True) * inv_n
    mean_sq = jnp.sum(h * h, axis=-1, keepdims=True) * inv_n
    var = mean_sq - mean * mean                       # biased, like torch LayerNorm
    hn = (h - mean) * jax.lax.rsqrt(var + LN_EPS)
    # gamma/beta are folded into w2/b2 (prepare_params); nonzero pad lanes of hn
    # are killed by the zero pad rows of w2.

    # ---- Linear(200 -> 784), padded 256 -> 896 ----
    y = jnp.dot(hn.astype(jnp.bfloat16), w2_ref[...], preferred_element_type=jnp.float32)

    # ---- bias + Sigmoid via tanh (one EUP op, no divide) ----
    y = y.astype(epilogue_dtype) + b2_ref[...].astype(epilogue_dtype)
    half = jnp.asarray(0.5, epilogue_dtype)
    act = half * jnp.tanh(half * y) + half

    # Store only the 784 real output columns (6 dense vregs + 1 masked vst per
    # row group); lane-dense bf16 store halves HBM write traffic vs f32.
    o_ref[...] = act[:, :D_OUT].astype(o_ref.dtype)


@functools.partial(jax.jit, static_argnames=("tb", "use_bf16_epilogue"))
def _generator_forward_impl(x, padded_params, *, tb, use_bf16_epilogue):
    w1, b1, w2, b2 = padded_params
    B = x.shape[0]

    # Batch tile: big enough to amortize ~0.35us/step, but guarantee >=2 grid
    # steps whenever B allows it so ("parallel",) can shard across the two
    # v7x TensorCores.  Round to 16 rows (bf16 sublane pack).
    half_batch = _round_up(pl.cdiv(max(B, 1), 2), 16)
    TB = max(16, min(tb, half_batch))
    B_pad = _round_up(B, TB)

    # Pad batch + features; cast matmul input to bf16 wrapper-side so the
    # HBM->VMEM DMA already carries half the bytes.
    x_p = jnp.pad(x, ((0, B_pad - B), (0, D_IN_P - D_IN))).astype(jnp.bfloat16)

    grid = (B_pad // TB,)

    def w_spec(shape):
        # Constant index_map: weight block is identical at every grid step, so
        # it is DMA'd once and stays resident in VMEM.
        return pl.BlockSpec(shape, lambda i: (0, 0))

    flops = 2 * B_pad * (D_IN_P * D_HID_P + D_HID_P * D_OUT_P)
    transcendentals = B_pad * D_OUT_P            # tanh per (padded) output element
    bytes_accessed = (
        x_p.size * x_p.dtype.itemsize
        + sum(int(p.size) * p.dtype.itemsize for p in padded_params)
        + B_pad * D_OUT * 2                      # bf16 output store
    )

    epilogue_dtype = jnp.bfloat16 if use_bf16_epilogue else jnp.float32
    kernel = functools.partial(generator_kernel, epilogue_dtype=epilogue_dtype)

    out = pl.pallas_call(
        kernel,
        out_shape=jax.ShapeDtypeStruct((B_pad, D_OUT), jnp.bfloat16),
        grid=grid,
        in_specs=[
            pl.BlockSpec((TB, D_IN_P), lambda i: (i, 0)),   # x tile (pipelined)
            w_spec((D_IN_P, D_HID_P)),                      # w1 (resident)
            w_spec((1, D_HID_P)),                           # b1
            w_spec((D_HID_P, D_OUT_P)),                     # w2 * gamma (resident)
            w_spec((1, D_OUT_P)),                           # beta @ w2 + b2
        ],
        # Last block dim == full array dim (784), so the (8,128) rule is waived.
        out_specs=pl.BlockSpec((TB, D_OUT), lambda i: (i, 0)),
        compiler_params=pltpu.CompilerParams(
            dimension_semantics=("parallel",),
            vmem_limit_bytes=32 * 1024 * 1024,
        ),
        cost_estimate=pl.CostEstimate(
            flops=flops,
            transcendentals=transcendentals,
            bytes_accessed=bytes_accessed,
        ),
    )(x_p, w1, b1, w2, b2)

    # Row-pad slice only (no column re-slice); no-op copy when B % TB == 0.
    return out if B_pad == B else out[:B]


def generator_forward(x, padded_params, *, tb=1024):
    """x: (B, 100) float32 -> (B, 784) bfloat16 (sigmoid output)."""
    return _generator_forward_impl(
        x, padded_params, tb=tb, use_bf16_epilogue=_bf16_epilogue_ok())


def init_params(key):
    """PyTorch-default-like Linear init, logical (unpadded) shapes, f32."""
    k1, k2, k3, k4 = jax.random.split(key, 4)
    lim1 = 1.0 / jnp.sqrt(jnp.float32(D_IN))
    lim2 = 1.0 / jnp.sqrt(jnp.float32(D_HID))
    # stored (in, out) so the kernel computes x @ W  (== x @ W.T for torch's (out, in) W)
    w1 = jax.random.uniform(k1, (D_IN, D_HID), jnp.float32, -lim1, lim1)
    b1 = jax.random.uniform(k2, (D_HID,), jnp.float32, -lim1, lim1)
    gamma = jnp.ones((D_HID,), jnp.float32)    # LayerNorm weight
    beta = jnp.zeros((D_HID,), jnp.float32)    # LayerNorm bias
    w2 = jax.random.uniform(k3, (D_HID, D_OUT), jnp.float32, -lim2, lim2)
    b2 = jax.random.uniform(k4, (D_OUT,), jnp.float32, -lim2, lim2)
    return (w1, b1, gamma, beta, w2, b2)


def prepare_params(params):
    """Zero-pad to lane-aligned shapes, fold LayerNorm affine into Linear #2,
    and cast matmul weights to bf16."""
    w1, b1, gamma, beta, w2, b2 = params
    # (hn * gamma + beta) @ w2 + b2  ==  hn @ (diag(gamma) @ w2) + (beta @ w2 + b2)
    w2_eff = gamma[:, None] * w2
    b2_eff = beta @ w2 + b2

    w1p = jnp.zeros((D_IN_P, D_HID_P), jnp.bfloat16).at[:D_IN, :D_HID].set(
        w1.astype(jnp.bfloat16))
    b1p = jnp.zeros((1, D_HID_P), jnp.float32).at[0, :D_HID].set(b1)
    w2p = jnp.zeros((D_HID_P, D_OUT_P), jnp.bfloat16).at[:D_HID, :D_OUT].set(
        w2_eff.astype(jnp.bfloat16))
    b2p = jnp.zeros((1, D_OUT_P), jnp.float32).at[0, :D_OUT].set(b2_eff)
    return (w1p, b1p, w2p, b2p)


def reference_forward(x, params):
    """Pure-JAX f32 reference of the same forward pass."""
    w1, b1, gamma, beta, w2, b2 = params
    h = x @ w1 + b1
    h = jnp.where(h > 0, h, LEAKY_SLOPE * h)
    mean = jnp.mean(h, axis=-1, keepdims=True)
    var = jnp.mean((h - mean) ** 2, axis=-1, keepdims=True)
    h = (h - mean) / jnp.sqrt(var + LN_EPS)
    h = h * gamma + beta
    y = h @ w2 + b2
    return jax.nn.sigmoid(y)


if __name__ == "__main__":
    key = jax.random.PRNGKey(0)
    k_param, k_x = jax.random.split(key)

    params = init_params(k_param)
    padded_params = prepare_params(params)

    B = 8  # small batch of latent noise vectors, like torch.randn(100)
    x = jax.random.normal(k_x, (B, D_IN), jnp.float32)

    out = generator_forward(x, padded_params)
    out = jax.block_until_ready(out)

    ref = reference_forward(x, params)
    assert out.shape == (B, D_OUT), out.shape
    max_err = float(jnp.max(jnp.abs(out.astype(jnp.float32) - ref)))
    # bf16 matmul inputs + bf16 output store (+ bf16 epilogue on v6e/v7x)
    # vs a full-f32 reference of a sigmoid in [0, 1].
    assert max_err < 3e-2, max_err

    print("KERNEL_OK")
</pallas_src>

<mosaic_0001>
module attributes {stable_mosaic.version = 11 : i64} {
  func.func @generator_kernel(%arg0: i32, %arg1: memref<16x128xbf16, #tpu.memory_space<vmem>>, %arg2: memref<128x256xbf16, #tpu.memory_space<vmem>>, %arg3: memref<1x256xf32, #tpu.memory_space<vmem>>, %arg4: memref<256x896xbf16, #tpu.memory_space<vmem>>, %arg5: memref<1x896xf32, #tpu.memory_space<vmem>>, %arg6: memref<16x784xbf16, #tpu.memory_space<vmem>>) attributes {dimension_semantics = [#tpu.dimension_semantics<parallel>], iteration_bounds = array<i64: 1>, scalar_prefetch = 0 : i64, scratch_operands = 0 : i64, tpu.core_type = #tpu.core_type<tc>, window_params = [{transform_indices = @transform_0, window_bounds = array<i64: 16, 128>}, {pipeline_mode = #tpu.pipeline_mode<synchronous>, transform_indices = @transform_1, window_bounds = array<i64: 128, 256>}, {pipeline_mode = #tpu.pipeline_mode<synchronous>, transform_indices = @transform_2, window_bounds = array<i64: 1, 256>}, {pipeline_mode = #tpu.pipeline_mode<synchronous>, transform_indices = @transform_3, window_bounds = array<i64: 256, 896>}, {pipeline_mode = #tpu.pipeline_mode<synchronous>, transform_indices = @transform_4, window_bounds = array<i64: 1, 896>}, {transform_indices = @transform_5, window_bounds = array<i64: 16, 784>}]} {
    %c0 = arith.constant 0 : index
    %c0_0 = arith.constant 0 : index
    %0 = vector.load %arg1[%c0, %c0_0] : memref<16x128xbf16, #tpu.memory_space<vmem>>, vector<16x128xbf16>
    %c0_1 = arith.constant 0 : index
    %c0_2 = arith.constant 0 : index
    %1 = vector.load %arg2[%c0_1, %c0_2] : memref<128x256xbf16, #tpu.memory_space<vmem>>, vector<128x256xbf16>
    %cst = arith.constant dense<0.000000e+00> : vector<16x256xf32>
    %2 = tpu.matmul %0, %1, %cst {dimension_numbers = #tpu.dot_dimension_numbers<[1], [0], [0], [1], [0, 0, 1, 1], [], []>} : vector<16x128xbf16>, vector<128x256xbf16>, vector<16x256xf32> -> vector<16x256xf32>
    %c0_3 = arith.constant 0 : index
    %c0_4 = arith.constant 0 : index
    %3 = vector.load %arg3[%c0_3, %c0_4] : memref<1x256xf32, #tpu.memory_space<vmem>>, vector<1x256xf32>
    %4 = vector.broadcast %3 : vector<1x256xf32> to vector<16x256xf32>
    %5 = arith.addf %2, %4 : vector<16x256xf32>
    %cst_5 = arith.constant 0.000000e+00 : f32
    %6 = vector.broadcast %cst_5 : f32 to vector<16x256xf32>
    %7 = arith.cmpf ogt, %5, %6 : vector<16x256xf32>
    %cst_6 = arith.constant 2.000000e-02 : f32
    %8 = vector.broadcast %cst_6 : f32 to vector<16x256xf32>
    %9 = arith.mulf %8, %5 : vector<16x256xf32>
    %10 = arith.select %7, %5, %9 : vector<16x256xi1>, vector<16x256xf32>
    %cst_7 = arith.constant dense<0.000000e+00> : vector<16xf32>
    %11 = vector.multi_reduction <add>, %10, %cst_7 [1] : vector<16x256xf32> to vector<16xf32>
    %12 = vector.shape_cast %11 : vector<16xf32> to vector<16x1xf32>
    %cst_8 = arith.constant 5.000000e-03 : f32
    %13 = vector.broadcast %cst_8 : f32 to vector<16x1xf32>
    %14 = arith.mulf %12, %13 : vector<16x1xf32>
    %15 = arith.mulf %10, %10 : vector<16x256xf32>
    %cst_9 = arith.constant dense<0.000000e+00> : vector<16xf32>
    %16 = vector.multi_reduction <add>, %15, %cst_9 [1] : vector<16x256xf32> to vector<16xf32>
    %17 = vector.shape_cast %16 : vector<16xf32> to vector<16x1xf32>
    %cst_10 = arith.constant 5.000000e-03 : f32
    %18 = vector.broadcast %cst_10 : f32 to vector<16x1xf32>
    %19 = arith.mulf %17, %18 : vector<16x1xf32>
    %20 = arith.mulf %14, %14 : vector<16x1xf32>
    %21 = arith.subf %19, %20 : vector<16x1xf32>
    %22 = vector.broadcast %14 : vector<16x1xf32> to vector<16x256xf32>
    %23 = arith.subf %10, %22 : vector<16x256xf32>
    %cst_11 = arith.constant 9.99999974E-6 : f32
    %24 = vector.broadcast %cst_11 : f32 to vector<16x1xf32>
    %25 = arith.addf %21, %24 : vector<16x1xf32>
    %26 = math.rsqrt %25 : vector<16x1xf32>
    %27 = vector.broadcast %26 : vector<16x1xf32> to vector<16x256xf32>
    %28 = arith.mulf %23, %27 : vector<16x256xf32>
    %29 = arith.truncf %28 : vector<16x256xf32> to vector<16x256xbf16>
    %c0_12 = arith.constant 0 : index
    %c0_13 = arith.constant 0 : index
    %30 = vector.load %arg4[%c0_12, %c0_13] : memref<256x896xbf16, #tpu.memory_space<vmem>>, vector<256x896xbf16>
    %cst_14 = arith.constant dense<0.000000e+00> : vector<16x896xf32>
    %31 = tpu.matmul %29, %30, %cst_14 {dimension_numbers = #tpu.dot_dimension_numbers<[1], [0], [0], [1], [0, 0, 1, 1], [], []>} : vector<16x256xbf16>, vector<256x896xbf16>, vector<16x896xf32> -> vector<16x896xf32>
    %c0_15 = arith.constant 0 : index
    %c0_16 = arith.constant 0 : index
    %32 = vector.load %arg5[%c0_15, %c0_16] : memref<1x896xf32, #tpu.memory_space<vmem>>, vector<1x896xf32>
    %33 = vector.broadcast %32 : vector<1x896xf32> to vector<16x896xf32>
    %34 = arith.addf %31, %33 : vector<16x896xf32>
    %cst_17 = arith.constant 5.000000e-01 : f32
    %35 = vector.broadcast %cst_17 : f32 to vector<16x896xf32>
    %36 = arith.mulf %35, %34 : vector<16x896xf32>
    %37 = math.tanh %36 : vector<16x896xf32>
    %cst_18 = arith.constant 5.000000e-01 : f32
    %38 = vector.broadcast %cst_18 : f32 to vector<16x896xf32>
    %39 = arith.mulf %38, %37 : vector<16x896xf32>
    %cst_19 = arith.constant 5.000000e-01 : f32
    %40 = vector.broadcast %cst_19 : f32 to vector<16x896xf32>
    %41 = arith.addf %39, %40 : vector<16x896xf32>
    %42 = vector.extract_strided_slice %41 {offsets = [0, 0], sizes = [16, 784], strides = [1, 1]} : vector<16x896xf32> to vector<16x784xf32>
    %43 = arith.truncf %42 : vector<16x784xf32> to vector<16x784xbf16>
    %c0_20 = arith.constant 0 : index
    %c0_21 = arith.constant 0 : index
    %44 = vector.load %arg6[%c0_20, %c0_21] : memref<16x784xbf16, #tpu.memory_space<vmem>>, vector<16x784xbf16>
    tpu.vector_store %arg6[%c0_20, %c0_21], %43 {strides = array<i32>} : memref<16x784xbf16, #tpu.memory_space<vmem>>, vector<16x784xbf16>,
    return
  }
  func.func @transform_0(%arg0: i32) -> (i32, i32) {
    %c0_i32 = arith.constant 0 : i32
    %c0_i32_0 = arith.constant 0 : i32
    return %arg0, %c0_i32 : i32, i32
  }
  func.func @transform_1(%arg0: i32) -> (i32, i32) {
    %c0_i32 = arith.constant 0 : i32
    %c0_i32_0 = arith.constant 0 : i32
    %c0_i32_1 = arith.constant 0 : i32
    return %c0_i32, %c0_i32_0 : i32, i32
  }
  func.func @transform_2(%arg0: i32) -> (i32, i32) {
    %c0_i32 = arith.constant 0 : i32
    %c0_i32_0 = arith.constant 0 : i32
    %c0_i32_1 = arith.constant 0 : i32
    return %c0_i32, %c0_i32_0 : i32, i32
  }
  func.func @transform_3(%arg0: i32) -> (i32, i32) {
    %c0_i32 = arith.constant 0 : i32
    %c0_i32_0 = arith.constant 0 : i32
    %c0_i32_1 = arith.constant 0 : i32
    return %c0_i32, %c0_i32_0 : i32, i32
  }
  func.func @transform_4(%arg0: i32) -> (i32, i32) {
    %c0_i32 = arith.constant 0 : i32
    %c0_i32_0 = arith.constant 0 : i32
    %c0_i32_1 = arith.constant 0 : i32
    return %c0_i32, %c0_i32_0 : i32, i32
  }
  func.func @transform_5(%arg0: i32) -> (i32, i32) {
    %c0_i32 = arith.constant 0 : i32
    %c0_i32_0 = arith.constant 0 : i32
    return %arg0, %c0_i32 : i32, i32
  }
}

</mosaic_0001>

<bundles_post_ra>
// kernel: _generator_forward_impl.1
= control target key start
LH: loop header
LB: loop body
LE: loop exit
PB: predicated region body
PF: predicated region fallthrough
CT: control target
= control target key end

     0   :  { %10 = vsyncpa [#allocation3], 0  ;;  %s1851_s0 = inlined_call_operand.vmem [shape: bf16[16,128], index: 0, kind: input, shape index: {}]   ;;  %s1852_s1 = inlined_call_operand.hbm [shape: bf16[128,256], index: 1, kind: input, shape index: {}]   ;;  %s1853_s2 = inlined_call_operand.vmem [shape: f32[1,256], index: 2, kind: input, shape index: {}]   ;;  %s1854_s3 = inlined_call_operand.hbm [shape: bf16[256,896], index: 3, kind: input, shape index: {}]   ;;  %s1855_s4 = inlined_call_operand.vmem [shape: f32[1,896], index: 4, kind: input, shape index: {}]   ;;  %s1856_s5 = inlined_call_operand.vmem [shape: bf16[16,784], index: 5, kind: output, shape index: {}]  }
   0x1   :  { %11 = vsyncpa [#allocation5], 0  ;;  %s1719_s18 = smov [#allocation2]  }
   0x2   :  { %s19_s19 = sshll.u32 %s1719_s18, 4  ;;  %s20_s19 = int_to_ptr.vmem [resolvable:$true] %s19_s19 }
   0x3   :  { %s1683_s20 = scalar_lea.vmem %s20_s19, 2048  ;;  %p1688_p1 = scmp.lt.s32.totalorder %s20_s19, %s20_s19 }
   0x4   :  { %p1684_p0 = scmp.ne.s32.totalorder %s20_s19, %s1683_s20  ;;  %p1689_p2 = scmp.lt.s32.totalorder %s1683_s20, %s1683_s20 }
   0x6   :  { %p1690_p3 = por %p1689_p2, %p1688_p1 }
   0x8   :  { %p1691_p4 = pnand %p1690_p3, %p1684_p0 }
   0xa   :  { %1694 = shalt.err (!%p1691_p4)
}
   0xb   :  { %s1720_s21 = smov 128   ;;  %s1721_s22 = smov 8  }
   0xc   :  { %25 = dma.hbm_to_vmem [thread:$0]  %s1852_s1, 2048, %s20_s19, [#allocation3], %s1720_s21, %s1720_s21, %s1721_s22  }
   0xd   :  { %s1722_s25 = smov [#allocation4]  }
   0xe   :  { %s33_s26 = sshll.u32 %s1722_s25, 4  ;;  %s34_s26 = int_to_ptr.vmem [resolvable:$true] %s33_s26 }
   0xf   :  { %s1703_s27 = scalar_lea.vmem %s34_s26, 14336  ;;  %p1708_p6 = scmp.lt.s32.totalorder %s34_s26, %s34_s26 }
  0x10   :  { %p1704_p5 = scmp.ne.s32.totalorder %s34_s26, %s1703_s27  ;;  %p1709_p7 = scmp.lt.s32.totalorder %s1703_s27, %s1703_s27 }
  0x12   :  { %p1710_p8 = por %p1709_p7, %p1708_p6 }
  0x14   :  { %p1711_p9 = pnand %p1710_p8, %p1704_p5 }
  0x16   :  { %1714 = shalt.err (!%p1711_p9)
}
  0x17   :  { %s1723_s28 = smov 448   ;;  %s1724_s29 = smov 28  }
  0x18   :  { %39 = dma.hbm_to_vmem [thread:$0]  %s1854_s3, 14336, %s34_s26, [#allocation5], %s1723_s28, %s1723_s28, %s1724_s29  }
  0x19   :  { %1715 = dma.done.wait [#allocation3], 2048  }
  0x1a   :  { %1716 = vsyncadd [#allocation3], 4294965248 }
  0x1b   :  { %1717 = dma.done.wait [#allocation5], 14336  }
  0x1c   :  { %1718 = vsyncadd [#allocation5], 4294952960  ;;  %v1725_v0 = vmov 0   ;;  %v1458_v1 = vld [vmem:[#allocation2 + $0x74] ss:$8 sps:$4 sm:$0xff]   ;;  %v1482_v17 = vld [vmem:[%s1851_s0] sm:$0xff]   ;;  %v69_v54 = vlaneseq }
  0x1d   :  { %197 = vmatprep.mubr.bf16.mxu0 %v1725_v0  ;;  %v1460_v2 = vld [vmem:[#allocation2 + $0x70] ss:$8 sps:$4 sm:$0xff]   ;;  %165 = vmatprep.subr.bf16.mxu0 %v1458_v1  ;;  %v1461_v3 = vld [vmem:[#allocation2 + $0x64] ss:$8 sps:$4 sm:$0xff]   ;;  %v1463_v4 = vld [vmem:[#allocation2 + $0x60] ss:$8 sps:$4 sm:$0xff]  }
  0x1e   :  { %166 = vmatpush1.bf16.msra.mxu0 %v1460_v2  ;;  %v1464_v5 = vld [vmem:[#allocation2 + $0x54] ss:$8 sps:$4 sm:$0xff]   ;;  %v1466_v6 = vld [vmem:[#allocation2 + $0x50] ss:$8 sps:$4 sm:$0xff]   ;;  %v1467_v7 = vld [vmem:[#allocation2 + $0x44] ss:$8 sps:$4 sm:$0xff]  }
  0x1f   :  { %167 = vmatprep.subr.bf16.mxu0 %v1461_v3  ;;  %v1469_v8 = vld [vmem:[#allocation2 + $0x40] ss:$8 sps:$4 sm:$0xff]   ;;  %v1470_v9 = vld [vmem:[#allocation2 + $0x34] ss:$8 sps:$4 sm:$0xff]   ;;  %v1472_v10 = vld [vmem:[#allocation2 + $0x30] ss:$8 sps:$4 sm:$0xff]  }
  0x20   :  { %v1473_v11 = vld [vmem:[#allocation2 + $0x24] ss:$8 sps:$4 sm:$0xff]   ;;  %v1475_v12 = vld [vmem:[#allocation2 + $0x20] ss:$8 sps:$4 sm:$0xff]   ;;  %v1476_v13 = vld [vmem:[#allocation2 + $0x14] ss:$8 sps:$4 sm:$0xff]  }
  0x21   :  { %v1478_v14 = vld [vmem:[#allocation2 + $0x10] ss:$8 sps:$4 sm:$0xff]   ;;  %v1479_v15 = vld [vmem:[#allocation2 + $0x4] ss:$8 sps:$4 sm:$0xff]   ;;  %v1481_v16 = vld [vmem:[#allocation2] ss:$8 sps:$4 sm:$0xff]  }
  0x22   :  { %168 = vmatpush1.bf16.msra.mxu0 %v1463_v4  ;;  %v1483_v18 = vld [vmem:[#allocation4 + $0x18c] ss:$28 sps:$4 sm:$0xff]   ;;  %v1487_v20 = vld [vmem:[#allocation4 + $0x194] ss:$28 sps:$4 sm:$0xff]   ;;  %v1493_v23 = vld [vmem:[#allocation4 + $0x15c] ss:$28 sps:$4 sm:$0xff]  }
  0x23   :  { %169 = vmatprep.subr.bf16.mxu0 %v1464_v5  ;;  %v1485_v19 = vld [vmem:[#allocation4 + $0x190] ss:$28 sps:$4 sm:$0xff]   ;;  %v1488_v21 = vld [vmem:[#allocation4 + $0x188] ss:$28 sps:$4 sm:$0xff]   ;;  %999 = vmatprep.subr.bf16.mxu1 %v1483_v18  ;;  %v1491_v24 = vld [vmem:[#allocation4 + $0x158] ss:$28 sps:$4 sm:$0xff]  }
  0x24   :  { %v1489_v22 = vld [vmem:[#allocation4 + $0x154] ss:$28 sps:$4 sm:$0xff]   ;;  %1000 = vmatpush1.bf16.msra.mxu1 %v1488_v21  ;;  %v1495_v26 = vld [vmem:[#allocation4 + $0x11c] ss:$28 sps:$4 sm:$0xff]   ;;  %v1499_v27 = vld [vmem:[#allocation4 + $0x124] ss:$28 sps:$4 sm:$0xff]  }
  0x25   :  { %v1494_v25 = vld [vmem:[#allocation4 + $0x150] ss:$28 sps:$4 sm:$0xff]   ;;  %1001 = vmatprep.subr.bf16.mxu1 %v1489_v22  ;;  %v1497_v28 = vld [vmem:[#allocation4 + $0x120] ss:$28 sps:$4 sm:$0xff]   ;;  %v1500_v29 = vld [vmem:[#allocation4 + $0x118] ss:$28 sps:$4 sm:$0xff]  }
  0x26   :  { %170 = vmatpush1.bf16.msra.mxu0 %v1466_v6  ;;  %v1501_v30 = vld [vmem:[#allocation4 + $0xe4] ss:$28 sps:$4 sm:$0xff]   ;;  %v1505_v31 = vld [vmem:[#allocation4 + $0xec] ss:$28 sps:$4 sm:$0xff]   ;;  %v1511_v35 = vld [vmem:[#allocation4 + $0xb4] ss:$28 sps:$4 sm:$0xff]  }
  0x27   :  { %171 = vmatprep.subr.bf16.mxu0 %v1467_v7  ;;  %v1503_v32 = vld [vmem:[#allocation4 + $0xe8] ss:$28 sps:$4 sm:$0xff]   ;;  %v1506_v33 = vld [vmem:[#allocation4 + $0xe0] ss:$28 sps:$4 sm:$0xff]   ;;  %v1509_v36 = vld [vmem:[#allocation4 + $0xb0] ss:$28 sps:$4 sm:$0xff]  }
  0x28   :  { %1002 = vmatpush1.bf16.msra.mxu1 %v1494_v25  ;;  %v1507_v34 = vld [vmem:[#allocation4 + $0xac] ss:$28 sps:$4 sm:$0xff]   ;;  %v1513_v38 = vld [vmem:[#allocation4 + $0x74] ss:$28 sps:$4 sm:$0xff]   ;;  %v1517_v39 = vld [vmem:[#allocation4 + $0x7c] ss:$28 sps:$4 sm:$0xff]  }
  0x29   :  { %1003 = vmatprep.subr.bf16.mxu1 %v1495_v26  ;;  %v1512_v37 = vld [vmem:[#allocation4 + $0xa8] ss:$28 sps:$4 sm:$0xff]   ;;  %v1515_v40 = vld [vmem:[#allocation4 + $0x78] ss:$28 sps:$4 sm:$0xff]   ;;  %v1518_v41 = vld [vmem:[#allocation4 + $0x70] ss:$28 sps:$4 sm:$0xff]  }
  0x2a   :  { %172 = vmatpush1.bf16.msra.mxu0 %v1469_v8  ;;  %v1519_v42 = vld [vmem:[#allocation4 + $0x3c] ss:$28 sps:$4 sm:$0xff]   ;;  %v1523_v43 = vld [vmem:[#allocation4 + $0x44] ss:$28 sps:$4 sm:$0xff]   ;;  %v1529_v47 = vld [vmem:[#allocation4 + $0xc] ss:$28 sps:$4 sm:$0xff]  }
  0x2b   :  { %173 = vmatprep.subr.bf16.mxu0 %v1470_v9  ;;  %v1521_v44 = vld [vmem:[#allocation4 + $0x40] ss:$28 sps:$4 sm:$0xff]   ;;  %v1524_v45 = vld [vmem:[#allocation4 + $0x38] ss:$28 sps:$4 sm:$0xff]   ;;  %v1527_v48 = vld [vmem:[#allocation4 + $0x8] ss:$28 sps:$4 sm:$0xff]  }
  0x2c   :  { %1004 = vmatpush1.bf16.msra.mxu1 %v1500_v29  ;;  %v1525_v46 = vld [vmem:[#allocation4 + $0x4] ss:$28 sps:$4 sm:$0xff]   ;;  %v1531_v50 = vld [vmem:[#allocation4 + $0x34c] ss:$28 sps:$4 sm:$0xff]   ;;  %v1535_v51 = vld [vmem:[#allocation4 + $0x354] ss:$28 sps:$4 sm:$0xff]  }
  0x2d   :  { %1005 = vmatprep.subr.bf16.mxu1 %v1501_v30  ;;  %v1530_v49 = vld [vmem:[#allocation4] ss:$28 sps:$4 sm:$0xff]   ;;  %v1533_v52 = vld [vmem:[#allocation4 + $0x350] ss:$28 sps:$4 sm:$0xff]   ;;  %v1536_v53 = vld [vmem:[#allocation4 + $0x348] ss:$28 sps:$4 sm:$0xff]  }
  0x2e   :  { %174 = vmatpush1.bf16.msra.mxu0 %v1472_v10  ;;  %v1765_v55 = vshrl.u32 %v69_v54, 7  ;;  %v67_v57 = vld [vmem:[%s1853_s2] sm:$0x3]  ;;  %v1537_v21 = vld [vmem:[#allocation4 + $0x314] ss:$28 sps:$4 sm:$0xff]   ;;  %vm1272_vm4 = vcmask 125952  }
  0x2f   :  { %175 = vmatprep.subr.bf16.mxu0 %v1473_v11  ;;  %v1541_v22 = vld [vmem:[#allocation4 + $0x31c] ss:$28 sps:$4 sm:$0xff]   ;;  %v1547_v26 = vld [vmem:[#allocation4 + $0x2e4] ss:$28 sps:$4 sm:$0xff]   ;;  %v1553_v30 = vld [vmem:[#allocation4 + $0x2ac] ss:$28 sps:$4 sm:$0xff]  }
  0x30   :  { %1006 = vmatpush1.bf16.msra.mxu1 %v1506_v33  ;;  %v71_v56 = vsub.s32 0, %v1765_v55  ;;  %v75_v58 = vsub.s32 1, %v1765_v55  ;;  %v1543_v25 = vld [vmem:[#allocation4 + $0x2dc] ss:$28 sps:$4 sm:$0xff]   ;;  %v1549_v29 = vld [vmem:[#allocation4 + $0x2a4] ss:$28 sps:$4 sm:$0xff]  }
  0x31   :  { %1007 = vmatprep.subr.bf16.mxu1 %v1507_v34  ;;  %v1555_v33 = vld [vmem:[#allocation4 + $0x26c] ss:$28 sps:$4 sm:$0xff]  }
  0x32   :  { %176 = vmatpush1.bf16.msra.mxu0 %v1475_v12  ;;  %v72_v59 = vrot.slane %v67_v57, %v71_v56  ;;  %v76_v60 = vrot.slane %v67_v57, %v75_v58  ;;  %v1557_v34 = vld [vmem:[#allocation4 + $0x270] ss:$28 sps:$4 sm:$0xff]  }
  0x33   :  { %177 = vmatprep.subr.bf16.mxu0 %v1476_v13 }
  0x34   :  { %1008 = vmatpush1.bf16.msra.mxu1 %v1512_v37  ;;  %v1561_v37 = vld [vmem:[#allocation4 + $0x234] ss:$28 sps:$4 sm:$0xff]  }
  0x35   :  { %1009 = vmatprep.subr.bf16.mxu1 %v1513_v38  ;;  %v1565_v38 = vld [vmem:[#allocation4 + $0x23c] ss:$28 sps:$4 sm:$0xff]  }
  0x36   :  { %178 = vmatpush1.bf16.msra.mxu0 %v1478_v14 }
  0x37   :  { %179 = vmatprep.subr.bf16.mxu0 %v1479_v15 }
  0x38   :  { %1010 = vmatpush1.bf16.msra.mxu1 %v1518_v41  ;;  %v1567_v41 = vld [vmem:[#allocation4 + $0x1fc] ss:$28 sps:$4 sm:$0xff]  }
  0x39   :  { %1011 = vmatprep.subr.bf16.mxu1 %v1519_v42  ;;  %v1571_v42 = vld [vmem:[#allocation4 + $0x204] ss:$28 sps:$4 sm:$0xff]  }
  0x3a   :  { %180 = vmatpush1.bf16.msra.mxu0 %v1481_v16 }
  0x3b   :  { %1042 = vmatprep.subr.bf16.mxu0 %v1487_v20 }
  0x3c   :  { %1012 = vmatpush1.bf16.msra.mxu1 %v1524_v45  ;;  %v1573_v45 = vld [vmem:[#allocation4 + $0x1c4] ss:$28 sps:$4 sm:$0xff]  }
  0x3d   :  { %198 = vmatmul.mubr.bf16.vlgmr.msra.gmra.mxu0 %v1482_v17  ;;  %1013 = vmatprep.subr.bf16.mxu1 %v1525_v46  ;;  %v1577_v46 = vld [vmem:[#allocation4 + $0x1cc] ss:$28 sps:$4 sm:$0xff]  }
  0x3e   :  { %1043 = vmatpush1.bf16.msra.mxu0 %v1485_v19 }
  0x3f   :  { %1044 = vmatprep.subr.bf16.mxu0 %v1493_v23  ;;  %v1539_v23 = vld [vmem:[#allocation4 + $0x318] ss:$28 sps:$4 sm:$0xff]  }
  0x40   :  { %1014 = vmatpush1.bf16.msra.mxu1 %v1530_v49  ;;  %v1581_v49 = vld [vmem:[#allocation4 + $0x19c] ss:$28 sps:$4 sm:$0xff]  }
  0x41   :  { %1015 = vmatprep.subr.bf16.mxu1 %v1531_v50  ;;  %v1582_v50 = vld [vmem:[#allocation4 + $0x360] ss:$28 sps:$4 sm:$0xff]  }
  0x42   :  { %1045 = vmatpush1.bf16.msra.mxu0 %v1491_v24  ;;  %v1542_v24 = vld [vmem:[#allocation4 + $0x310] ss:$28 sps:$4 sm:$0xff]  }
  0x43   :  { %1046 = vmatprep.subr.bf16.mxu0 %v1499_v27  ;;  %v1545_v27 = vld [vmem:[#allocation4 + $0x2e0] ss:$28 sps:$4 sm:$0xff]  }
  0x44   :  { %1016 = vmatpush2.bf16.msra.mxu1 %v1536_v53 }
  0x45   :  { %1017 = vmatprep.subr.bf16.mxu1 %v1537_v21  ;;  %v1583_v21 = vld [vmem:[#allocation4 + $0x1a0] ss:$28 sps:$4 sm:$0xff]  }
  0x46   :  { %1047 = vmatpush1.bf16.msra.mxu0 %v1497_v28  ;;  %v1548_v28 = vld [vmem:[#allocation4 + $0x2d8] ss:$28 sps:$4 sm:$0xff]  }
  0x47   :  { %1048 = vmatprep.subr.bf16.mxu0 %v1505_v31  ;;  %v1551_v31 = vld [vmem:[#allocation4 + $0x2a8] ss:$28 sps:$4 sm:$0xff]  }
  0x48   :  { %1018 = vmatpush2.bf16.msra.mxu1 %v1542_v24  ;;  %v1589_v24 = vld [vmem:[#allocation4 + $0x128] ss:$28 sps:$4 sm:$0xff]  }
  0x49   :  { %1019 = vmatprep.subr.bf16.mxu1 %v1543_v25  ;;  %v1593_v25 = vld [vmem:[#allocation4 + $0x130] ss:$28 sps:$4 sm:$0xff]  }
  0x4a   :  { %1049 = vmatpush1.bf16.msra.mxu0 %v1503_v32  ;;  %v1554_v32 = vld [vmem:[#allocation4 + $0x2a0] ss:$28 sps:$4 sm:$0xff]  }
  0x4b   :  { %1050 = vmatprep.subr.bf16.mxu0 %v1511_v35  ;;  %v1559_v35 = vld [vmem:[#allocation4 + $0x274] ss:$28 sps:$4 sm:$0xff]  }
  0x4c   :  { %1020 = vmatpush2.bf16.msra.mxu1 %v1548_v28  ;;  %v1594_v28 = vld [vmem:[#allocation4 + $0xf0] ss:$28 sps:$4 sm:$0xff]  }
  0x4d   :  { %1021 = vmatprep.subr.bf16.mxu1 %v1549_v29  ;;  %v1598_v29 = vld [vmem:[#allocation4 + $0xf8] ss:$28 sps:$4 sm:$0xff]  }
  0x4e   :  { %1051 = vmatpush1.bf16.msra.mxu0 %v1509_v36  ;;  %v1560_v36 = vld [vmem:[#allocation4 + $0x268] ss:$28 sps:$4 sm:$0xff]  }
  0x4f   :  { %1052 = vmatprep.subr.bf16.mxu0 %v1517_v39  ;;  %v1563_v39 = vld [vmem:[#allocation4 + $0x238] ss:$28 sps:$4 sm:$0xff]  }
  0x50   :  { %1022 = vmatpush2.bf16.msra.mxu1 %v1554_v32  ;;  %v1599_v32 = vld [vmem:[#allocation4 + $0xb8] ss:$28 sps:$4 sm:$0xff]  }
  0x51   :  { %1023 = vmatprep.subr.bf16.mxu1 %v1555_v33  ;;  %v1603_v33 = vld [vmem:[#allocation4 + $0xc0] ss:$28 sps:$4 sm:$0xff]  }
  0x52   :  { %1053 = vmatpush1.bf16.msra.mxu0 %v1515_v40  ;;  %v1566_v40 = vld [vmem:[#allocation4 + $0x230] ss:$28 sps:$4 sm:$0xff]  }
  0x53   :  { %1054 = vmatprep.subr.bf16.mxu0 %v1523_v43  ;;  %v1569_v43 = vld [vmem:[#allocation4 + $0x200] ss:$28 sps:$4 sm:$0xff]  }
  0x54   :  { %1024 = vmatpush2.bf16.msra.mxu1 %v1560_v36  ;;  %v1604_v36 = vld [vmem:[#allocation4 + $0x80] ss:$28 sps:$4 sm:$0xff]  }
  0x55   :  { %1025 = vmatprep.subr.bf16.mxu1 %v1561_v37  ;;  %v1608_v37 = vld [vmem:[#allocation4 + $0x88] ss:$28 sps:$4 sm:$0xff]  }
  0x56   :  { %1055 = vmatpush1.bf16.msra.mxu0 %v1521_v44  ;;  %v1572_v44 = vld [vmem:[#allocation4 + $0x1f8] ss:$28 sps:$4 sm:$0xff]  }
  0x57   :  { %1056 = vmatprep.subr.bf16.mxu0 %v1529_v47  ;;  %v1575_v47 = vld [vmem:[#allocation4 + $0x1c8] ss:$28 sps:$4 sm:$0xff]  }
  0x58   :  { %1026 = vmatpush2.bf16.msra.mxu1 %v1566_v40  ;;  %v1609_v40 = vld [vmem:[#allocation4 + $0x48] ss:$28 sps:$4 sm:$0xff]  }
  0x59   :  { %1027 = vmatprep.subr.bf16.mxu1 %v1567_v41  ;;  %v1613_v41 = vld [vmem:[#allocation4 + $0x50] ss:$28 sps:$4 sm:$0xff]  }
  0x5a   :  { %1057 = vmatpush1.bf16.msra.mxu0 %v1527_v48  ;;  %v1578_v48 = vld [vmem:[#allocation4 + $0x1c0] ss:$28 sps:$4 sm:$0xff]  }
  0x5b   :  { %1058 = vmatprep.subr.bf16.mxu0 %v1535_v51 }
  0x5c   :  { %1028 = vmatpush2.bf16.msra.mxu1 %v1572_v44  ;;  %v1614_v44 = vld [vmem:[#allocation4 + $0x10] ss:$28 sps:$4 sm:$0xff]  }
  0x5d   :  { %1029 = vmatprep.subr.bf16.mxu1 %v1573_v45  ;;  %v1618_v45 = vld [vmem:[#allocation4 + $0x18] ss:$28 sps:$4 sm:$0xff]  }
  0x5e   :  { %1059 = vmatpush2.bf16.msra.mxu0 %v1533_v52 }
  0x5f   :  { %1060 = vmatprep.subr.bf16.mxu0 %v1541_v22  ;;  %v1586_v22 = vld [vmem:[#allocation4 + $0x164] ss:$28 sps:$4 sm:$0xff]  }
  0x60   :  { %1030 = vmatpush2.bf16.msra.mxu1 %v1578_v48  ;;  %v1624_v48 = vld [vmem:[#allocation4 + $0x324] ss:$28 sps:$4 sm:$0xff]  }
  0x61   :  { %1085 = vmatprep.subr.bf16.mxu1 %v1581_v49  ;;  %v1622_v49 = vld [vmem:[#allocation4 + $0x320] ss:$28 sps:$4 sm:$0xff]  }
  0x62   :  { %1061 = vmatpush2.bf16.msra.mxu0 %v1539_v23  ;;  %v1592_v23 = vld [vmem:[#allocation4 + $0x2f0] ss:$28 sps:$4 sm:$0xff]  }
  0x63   :  { %1062 = vmatprep.subr.bf16.mxu0 %v1547_v26  ;;  %v1596_v26 = vld [vmem:[#allocation4 + $0xf4] ss:$28 sps:$4 sm:$0xff]  }
  0x66   :  { %1063 = vmatpush2.bf16.msra.mxu0 %v1545_v27  ;;  %v1597_v27 = vld [vmem:[#allocation4 + $0x2b8] ss:$28 sps:$4 sm:$0xff]  }
  0x67   :  { %1064 = vmatprep.subr.bf16.mxu0 %v1553_v30  ;;  %v1601_v30 = vld [vmem:[#allocation4 + $0xbc] ss:$28 sps:$4 sm:$0xff]  }
  0x6a   :  { %1065 = vmatpush2.bf16.msra.mxu0 %v1551_v31  ;;  %v1602_v31 = vld [vmem:[#allocation4 + $0x280] ss:$28 sps:$4 sm:$0xff]  }
  0x6b   :  { %1066 = vmatprep.subr.bf16.mxu0 %v1559_v35  ;;  %v1607_v35 = vld [vmem:[#allocation4 + $0x248] ss:$28 sps:$4 sm:$0xff]  }
  0x6e   :  { %1067 = vmatpush2.bf16.msra.mxu0 %v1557_v34  ;;  %v1606_v34 = vld [vmem:[#allocation4 + $0x84] ss:$28 sps:$4 sm:$0xff]  }
  0x6f   :  { %1068 = vmatprep.subr.bf16.mxu0 %v1565_v38  ;;  %v1611_v38 = vld [vmem:[#allocation4 + $0x4c] ss:$28 sps:$4 sm:$0xff]  }
  0x72   :  { %1069 = vmatpush2.bf16.msra.mxu0 %v1563_v39  ;;  %v1612_v39 = vld [vmem:[#allocation4 + $0x210] ss:$28 sps:$4 sm:$0xff]  }
  0x73   :  { %1070 = vmatprep.subr.bf16.mxu0 %v1571_v42  ;;  %v1616_v42 = vld [vmem:[#allocation4 + $0x14] ss:$28 sps:$4 sm:$0xff]  }
  0x76   :  { %1071 = vmatpush2.bf16.msra.mxu0 %v1569_v43  ;;  %v1617_v43 = vld [vmem:[#allocation4 + $0x1d8] ss:$28 sps:$4 sm:$0xff]  }
  0x77   :  { %1072 = vmatprep.subr.bf16.mxu0 %v1577_v46  ;;  %v1621_v46 = vld [vmem:[#allocation4 + $0x35c] ss:$28 sps:$4 sm:$0xff]  }
  0x7a   :  { %1073 = vmatpush2.bf16.msra.mxu0 %v1575_v47  ;;  %v1619_v47 = vld [vmem:[#allocation4 + $0x358] ss:$28 sps:$4 sm:$0xff]  }
  0x7b   :  { %1429 = vmatprep.subr.bf16.mxu0 %v1582_v50  ;;  %v1627_v50 = vld [vmem:[#allocation4 + $0x2ec] ss:$28 sps:$4 sm:$0xff]  }
  0xfd   :  { %v199_v61 = vpop.f32.mrf.mxu0 }
  0xfe   :  { %v200_v62 = vadd.f32 %v199_v61, %v72_v59 }
  0xff   :  { %v201_v63 = vpop.f32.mrf.mxu0 }
 0x100   :  { %v212_v0 = vmul.f32 0.02, %v200_v62  ;;  %v202_v1 = vadd.f32 %v201_v63, %v76_v60  ;;  %vm208_vm0 = vcmp.gt.f32.partialorder %v200_v62, 0.0 }
 0x101   :  { %v203_v2 = vpop.f32.mrf.mxu0 }
 0x102   :  { %v213_v3 = vmul.f32 0.02, %v202_v1  ;;  %v204_v4 = vadd.f32 %v203_v2, %v72_v59  ;;  %vm209_vm1 = vcmp.gt.f32.partialorder %v202_v1, 0.0  ;;  %v1776_v5 = vsel %vm208_vm0, %v200_v62, %v212_v0 }
 0x103   :  { %v205_v6 = vpop.f32.mrf.mxu0  ;;  %v228_v11 = vmul.f32 %v1776_v5, %v1776_v5 }
 0x104   :  { %vm210_vm2 = vcmp.gt.f32.partialorder %v204_v4, 0.0  ;;  %v214_v7 = vmul.f32 0.02, %v204_v4  ;;  %v206_v8 = vadd.f32 %v205_v6, %v76_v60  ;;  %v1778_v9 = vsel %vm209_vm1, %v202_v1, %v213_v3 }
 0x105   :  { %v220_v10 = vadd.f32 %v1778_v9, %v1776_v5  ;;  %v229_v12 = vmul.f32 %v1778_v9, %v1778_v9 }
 0x106   :  { %vm211_vm3 = vcmp.gt.f32.partialorder %v206_v8, 0.0  ;;  %v215_v13 = vmul.f32 0.02, %v206_v8  ;;  %v1786_v14 = vsel %vm210_vm2, %v204_v4, %v214_v7 }
 0x107   :  { %221 = vadd.xlane.f32.xlu0 %v220_v10  ;;  %v232_v15 = vadd.f32 %v229_v12, %v228_v11  ;;  %v230_v18 = vmul.f32 %v1786_v14, %v1786_v14 }
 0x108   :  { %v1788_v16 = vsel %vm211_vm3, %v206_v8, %v215_v13 }
 0x109   :  { %233 = vadd.xlane.f32.xlu1 %v232_v15  ;;  %v223_v17 = vadd.f32 %v1788_v16, %v1786_v14  ;;  %v231_v19 = vmul.f32 %v1788_v16, %v1788_v16 }
 0x10b   :  { %224 = vadd.xlane.f32.xlu0 %v223_v17  ;;  %v235_v20 = vadd.f32 %v231_v19, %v230_v18  ;;  %v1579_v19 = vld [vmem:[#allocation4 + $0x198] ss:$28 sps:$4 sm:$0xff]  }
 0x10d   :  { %236 = vadd.xlane.f32.xlu1 %v235_v20 }
 0x190   :  { %v222_v51 = vpop.xlane.xlu0 %221 }
 0x191   :  { %v226_v52 = vmul.f32 0.005, %v222_v51  ;;  %v1625_v51 = vld [vmem:[#allocation4 + $0x2e8] ss:$28 sps:$4 sm:$0xff]  }
 0x192   :  { %v234_v53 = vpop.xlane.xlu1 %233 }
 0x193   :  { %v238_v54 = vmul.f32 0.005, %v234_v53  ;;  %v240_v57 = vmul.f32 %v226_v52, %v226_v52  ;;  %v244_v6 = vsub.f32 %v1776_v5, %v226_v52  ;;  %v245_v7 = vsub.f32 %v1778_v9, %v226_v52  ;;  %v1587_v5 = vld [vmem:[#allocation4 + $0x328] ss:$28 sps:$4 sm:$0xff]   ;;  %v1584_v9 = vld [vmem:[#allocation4 + $0x160] ss:$28 sps:$4 sm:$0xff]  }
 0x194   :  { %v225_v59 = vpop.xlane.xlu0 %224  ;;  %v1630_v52 = vld [vmem:[#allocation4 + $0x2b4] ss:$28 sps:$4 sm:$0xff]  }
 0x195   :  { %v242_v60 = vsub.f32 %v238_v54, %v240_v57  ;;  %v227_v61 = vmul.f32 0.005, %v225_v59  ;;  %v1628_v53 = vld [vmem:[#allocation4 + $0x2b0] ss:$28 sps:$4 sm:$0xff]   ;;  %v1633_v54 = vld [vmem:[#allocation4 + $0x27c] ss:$28 sps:$4 sm:$0xff]  }
 0x196   :  { %v237_v62 = vpop.xlane.xlu1 %236  ;;  %v1631_v57 = vld [vmem:[#allocation4 + $0x278] ss:$28 sps:$4 sm:$0xff]   ;;  %v1636_v59 = vld [vmem:[#allocation4 + $0x244] ss:$28 sps:$4 sm:$0xff]  }
 0x197   :  { %v239_v63 = vmul.f32 0.005, %v237_v62  ;;  %v248_v0 = vadd.f32 1e-05, %v242_v60  ;;  %v241_v1 = vmul.f32 %v227_v61, %v227_v61  ;;  %v246_v8 = vsub.f32 %v1786_v14, %v227_v61  ;;  %v1588_v14 = vld [vmem:[#allocation4 + $0x168] ss:$28 sps:$4 sm:$0xff]  }
 0x198   :  { %v247_v10 = vsub.f32 %v1788_v16, %v227_v61  ;;  %v1591_v16 = vld [vmem:[#allocation4 + $0x12c] ss:$28 sps:$4 sm:$0xff]   ;;  %v1634_v60 = vld [vmem:[#allocation4 + $0x240] ss:$28 sps:$4 sm:$0xff]  }
 0x199   :  { %v243_v2 = vsub.f32 %v239_v63, %v241_v1  ;;  %1643 = vrsqrt.f32 %v248_v0  ;;  %v1639_v61 = vld [vmem:[#allocation4 + $0x20c] ss:$28 sps:$4 sm:$0xff]   ;;  %v1642_v63 = vld [vmem:[#allocation4 + $0x1d4] ss:$28 sps:$4 sm:$0xff]   ;;  %v398_v1 = vsub.s32 2, %v1765_v55 }
 0x19a   :  { %v1637_v62 = vld [vmem:[#allocation4 + $0x208] ss:$28 sps:$4 sm:$0xff]   ;;  %v1640_v0 = vld [vmem:[#allocation4 + $0x1d0] ss:$28 sps:$4 sm:$0xff]  }
 0x19b   :  { %v249_v3 = vadd.f32 1e-05, %v243_v2  ;;  %v1810_v2 = vld [vmem:[%s1855_s4] sm:$0xff] }
 0x19d   :  { %1645 = vrsqrt.f32 %v249_v3  ;;  %v402_v3 = vsub.s32 3, %v1765_v55 }
 0x1a6   :  { %v1644_v4 = vpop.eup %1643 }
 0x1a7   :  { %v253_v12 = vmul.f32 %v1644_v4, %v245_v7  ;;  %v252_v15 = vmul.f32 %v1644_v4, %v244_v6  ;;  %v391_v4 = vrot.slane %v1810_v2, %v71_v56  ;;  %v399_v6 = vrot.slane %v1810_v2, %v398_v1 }
 0x1a8   :  { %v395_v7 = vrot.slane %v1810_v2, %v75_v58 }
 0x1aa   :  { %v1646_v11 = vpop.eup %1645 }
 0x1ab   :  { %v255_v13 = vmul.f32 %v1646_v11, %v247_v10  ;;  %v254_v17 = vmul.f32 %v1646_v11, %v246_v8  ;;  %v403_v8 = vrot.slane %v1810_v2, %v402_v3 }
 0x1ad   :  { %v257_v18 = vpack.c.bf16 %v255_v13, %v253_v12  ;;  %v1800_v20 = vpack.c.bf16 %v254_v17, %v252_v15 }
 0x1af   :  { %1031 = vmatprep.mubr.bf16.mxu1 %v257_v18  ;;  %1074 = vmatprep.mubr.bf16.mxu0 %v257_v18 }
 0x1b0   :  { %1032 = vmatmul.mubr.bf16.vlgmr.msra.gmra.mxu1 %v1800_v20  ;;  %1075 = vmatmul.mubr.bf16.vlgmr.msra.gmra.mxu0 %v1800_v20 }
 0x1b1   :  { %1086 = vmatpush1.bf16.msra.mxu1 %v1579_v19  ;;  %1430 = vmatpush3.bf16.msra.mxu0 %v1583_v21 }
 0x1b2   :  { %1117 = vmatprep.mubr.bf16.mxu1 %v257_v18  ;;  %1160 = vmatprep.mubr.bf16.mxu0 %v257_v18 }
 0x1b3   :  { %1087 = vmatprep.subr.bf16.mxu1 %v1586_v22  ;;  %1431 = vmatprep.subr.bf16.mxu0 %v1587_v5 }
 0x1b5   :  { %1088 = vmatpush1.bf16.msra.mxu1 %v1584_v9  ;;  %1432 = vmatpush3.bf16.msra.mxu0 %v1588_v14 }
 0x1b6   :  { %1089 = vmatprep.subr.bf16.mxu1 %v1591_v16  ;;  %1433 = vmatprep.subr.bf16.mxu0 %v1592_v23 }
 0x1b9   :  { %1090 = vmatpush1.bf16.msra.mxu1 %v1589_v24  ;;  %1434 = vmatpush3.bf16.msra.mxu0 %v1593_v25 }
 0x1ba   :  { %1091 = vmatprep.subr.bf16.mxu1 %v1596_v26  ;;  %1435 = vmatprep.subr.bf16.mxu0 %v1597_v27 }
 0x1bd   :  { %1092 = vmatpush1.bf16.msra.mxu1 %v1594_v28  ;;  %1436 = vmatpush3.bf16.msra.mxu0 %v1598_v29 }
 0x1be   :  { %1093 = vmatprep.subr.bf16.mxu1 %v1601_v30  ;;  %1437 = vmatprep.subr.bf16.mxu0 %v1602_v31 }
 0x1c1   :  { %1094 = vmatpush1.bf16.msra.mxu1 %v1599_v32  ;;  %1438 = vmatpush3.bf16.msra.mxu0 %v1603_v33 }
 0x1c2   :  { %1095 = vmatprep.subr.bf16.mxu1 %v1606_v34  ;;  %1439 = vmatprep.subr.bf16.mxu0 %v1607_v35 }
 0x1c5   :  { %1096 = vmatpush1.bf16.msra.mxu1 %v1604_v36  ;;  %1440 = vmatpush3.bf16.msra.mxu0 %v1608_v37 }
 0x1c6   :  { %1097 = vmatprep.subr.bf16.mxu1 %v1611_v38  ;;  %1441 = vmatprep.subr.bf16.mxu0 %v1612_v39 }
 0x1c9   :  { %1098 = vmatpush1.bf16.msra.mxu1 %v1609_v40  ;;  %1442 = vmatpush3.bf16.msra.mxu0 %v1613_v41 }
 0x1ca   :  { %1099 = vmatprep.subr.bf16.mxu1 %v1616_v42  ;;  %1443 = vmatprep.subr.bf16.mxu0 %v1617_v43 }
 0x1cd   :  { %1100 = vmatpush1.bf16.msra.mxu1 %v1614_v44  ;;  %1444 = vmatpush3.bf16.msra.mxu0 %v1618_v45 }
 0x1ce   :  { %1101 = vmatprep.subr.bf16.mxu1 %v1621_v46 }
 0x1d0   :  { %1161 = vmatmul.mubr.bf16.vlgmr.msra.gmra.mxu0 %v1800_v20 }
 0x1d1   :  { %1102 = vmatpush2.bf16.msra.mxu1 %v1619_v47 }
 0x1d2   :  { %1103 = vmatprep.subr.bf16.mxu1 %v1624_v48 }
 0x1d5   :  { %1104 = vmatpush2.bf16.msra.mxu1 %v1622_v49 }
 0x1d6   :  { %1105 = vmatprep.subr.bf16.mxu1 %v1627_v50 }
 0x1d9   :  { %1106 = vmatpush2.bf16.msra.mxu1 %v1625_v51 }
 0x1da   :  { %1107 = vmatprep.subr.bf16.mxu1 %v1630_v52 }
 0x1dd   :  { %1108 = vmatpush2.bf16.msra.mxu1 %v1628_v53 }
 0x1de   :  { %1109 = vmatprep.subr.bf16.mxu1 %v1633_v54 }
 0x1e1   :  { %1110 = vmatpush2.bf16.msra.mxu1 %v1631_v57 }
 0x1e2   :  { %1111 = vmatprep.subr.bf16.mxu1 %v1636_v59 }
 0x1e5   :  { %1112 = vmatpush2.bf16.msra.mxu1 %v1634_v60  ;;  %v414_v60 = vsub.s32 6, %v1765_v55 }
 0x1e6   :  { %1113 = vmatprep.subr.bf16.mxu1 %v1639_v61 }
 0x1e9   :  { %1114 = vmatpush2.bf16.msra.mxu1 %v1637_v62 }
 0x1ea   :  { %1115 = vmatprep.subr.bf16.mxu1 %v1642_v63  ;;  %v415_v63 = vrot.slane %v1810_v2, %v414_v60 }
 0x1ed   :  { %1116 = vmatpush2.bf16.msra.mxu1 %v1640_v0 }
 0x1f0   :  { %1118 = vmatmul.mubr.bf16.vlgmr.msra.gmra.mxu1 %v1800_v20 }
 0x270   :  { %v1033_v10 = vpop.f32.mrf.mxu1  ;;  %v1076_v11 = vpop.f32.mrf.mxu0 }
 0x271   :  { %v1034_v12 = vadd.f32 %v1033_v10, %v391_v4  ;;  %v1077_v13 = vadd.f32 %v1076_v11, %v399_v6 }
 0x272   :  { %v1035_v15 = vpop.f32.mrf.mxu1  ;;  %v1078_v17 = vpop.f32.mrf.mxu0 }
 0x273   :  { %v1169_v18 = vmul.f32 0.5, %v1034_v12  ;;  %v1171_v19 = vmul.f32 0.5, %v1077_v13  ;;  %v1036_v20 = vadd.f32 %v1035_v15, %v395_v7  ;;  %v1079_v21 = vadd.f32 %v1078_v17, %v403_v8 }
 0x274   :  { %v1037_v22 = vpop.f32.mrf.mxu1  ;;  %v1080_v56 = vpop.f32.mrf.mxu0  ;;  %v406_v17 = vsub.s32 4, %v1765_v55 }
 0x275   :  { %1647 = vtanh.f32 %v1169_v18  ;;  %v1170_v5 = vmul.f32 0.5, %v1036_v20  ;;  %v1172_v9 = vmul.f32 0.5, %v1079_v21  ;;  %v1038_v14 = vadd.f32 %v1037_v22, %v391_v4 }
 0x276   :  { %1649 = vtanh.f32 %v1171_v19  ;;  %v1081_v58 = vadd.f32 %v1080_v56, %v399_v6  ;;  %v1039_v16 = vpop.f32.mrf.mxu1  ;;  %v1082_v23 = vpop.f32.mrf.mxu0  ;;  %v410_v21 = vsub.s32 5, %v1765_v55  ;;  %v407_v56 = vrot.slane %v1810_v2, %v406_v17 }
 0x277   :  { %1651 = vtanh.f32 %v1170_v5  ;;  %v1176_v24 = vmul.f32 0.5, %v1038_v14  ;;  %v1040_v25 = vadd.f32 %v1039_v16, %v395_v7  ;;  %v1083_v26 = vadd.f32 %v1082_v23, %v403_v8 }
 0x278   :  { %1653 = vtanh.f32 %v1172_v9  ;;  %v1178_v27 = vmul.f32 0.5, %v1081_v58  ;;  %v411_v9 = vrot.slane %v1810_v2, %v410_v21 }
 0x279   :  { %1655 = vtanh.f32 %v1176_v24  ;;  %v1177_v28 = vmul.f32 0.5, %v1040_v25  ;;  %v1179_v29 = vmul.f32 0.5, %v1083_v26 }
 0x27a   :  { %1657 = vtanh.f32 %v1178_v27 }
 0x27b   :  { %1659 = vtanh.f32 %v1177_v28 }
 0x27c   :  { %1661 = vtanh.f32 %v1179_v29 }
 0x282   :  { %v1648_v30 = vpop.eup %1647 }
 0x283   :  { %v1650_v31 = vpop.eup %1649  ;;  %v1197_v32 = vmul.f32 0.5, %v1648_v30 }
 0x284   :  { %v1652_v33 = vpop.eup %1651  ;;  %v1199_v34 = vmul.f32 0.5, %v1650_v31 }
 0x285   :  { %v1654_v35 = vpop.eup %1653  ;;  %v1198_v36 = vmul.f32 0.5, %v1652_v33  ;;  %v1211_v40 = vadd.f32 0.5, %v1197_v32 }
 0x286   :  { %v1656_v37 = vpop.eup %1655  ;;  %v1200_v38 = vmul.f32 0.5, %v1654_v35  ;;  %v1213_v44 = vadd.f32 0.5, %v1199_v34 }
 0x287   :  { %v1658_v39 = vpop.eup %1657  ;;  %v1212_v41 = vadd.f32 0.5, %v1198_v36  ;;  %v1204_v42 = vmul.f32 0.5, %v1656_v37 }
 0x288   :  { %v1660_v43 = vpop.eup %1659  ;;  %v1214_v45 = vadd.f32 0.5, %v1200_v38  ;;  %v1206_v46 = vmul.f32 0.5, %v1658_v39 }
 0x289   :  { %v1662_v47 = vpop.eup %1661  ;;  %v1421_v48 = vpack.c.bf16 %v1212_v41, %v1211_v40  ;;  %v1205_v49 = vmul.f32 0.5, %v1660_v43  ;;  %v1218_v52 = vadd.f32 0.5, %v1204_v42 }
 0x28a   :  { %v1422_v50 = vpack.c.bf16 %v1214_v45, %v1213_v44  ;;  %v1207_v51 = vmul.f32 0.5, %v1662_v47  ;;  %v1220_v54 = vadd.f32 0.5, %v1206_v46 }
 0x28b   :  { %1269 = vst [vmem:[%s1856_s5] sm:$0xff] %v1421_v48  ;;  %v1219_v53 = vadd.f32 0.5, %v1205_v49 }
 0x28c   :  { %1270 = vst [vmem:[%s1856_s5 + $0x8] sm:$0xff] %v1422_v50  ;;  %v1221_v57 = vadd.f32 0.5, %v1207_v51 }
 0x28d   :  { %v1425_v59 = vpack.c.bf16 %v1219_v53, %v1218_v52 }
 0x28e   :  { %v1426_v61 = vpack.c.bf16 %v1221_v57, %v1220_v54 }
 0x28f   :  { %1274 = vst [vmem:[%s1856_s5 + $0x1c] sm:$0xff] %v1425_v59 }
 0x290   :  { %1275 = vst [vmem:[%s1856_s5 + $0x24] sm:$0xff] %v1426_v61  ;;  %v1445_v62 = vpop.f32.mrf.mxu0 }
 0x292   :  { %v1446_v0 = vpop.f32.mrf.mxu0 }
 0x293   :  { %v1447_v1 = vadd.f32 %v1446_v0, %v1445_v62 }
 0x294   :  { %v1448_v3 = vpop.f32.mrf.mxu0 }
 0x295   :  { %v1163_v4 = vadd.f32 %v1447_v1, %v415_v63 }
 0x296   :  { %v1449_v6 = vpop.f32.mrf.mxu0 }
 0x297   :  { %v1175_v7 = vmul.f32 0.5, %v1163_v4  ;;  %v1450_v8 = vadd.f32 %v1449_v6, %v1448_v3 }
 0x299   :  { %1663 = vtanh.f32 %v1175_v7  ;;  %v1166_v10 = vadd.f32 %v1450_v8, %v415_v63 }
 0x29b   :  { %v1182_v11 = vmul.f32 0.5, %v1166_v10 }
 0x29d   :  { %1665 = vtanh.f32 %v1182_v11 }
 0x2a6   :  { %v1664_v12 = vpop.eup %1663 }
 0x2a7   :  { %v1203_v13 = vmul.f32 0.5, %v1664_v12 }
 0x2a9   :  { %v1217_v15 = vadd.f32 0.5, %v1203_v13 }
 0x2aa   :  { %v1666_v18 = vpop.eup %1665 }
 0x2ab   :  { %v1424_v19 = vpack.c.bf16 %v1217_v15, %v1217_v15  ;;  %v1210_v20 = vmul.f32 0.5, %v1666_v18 }
 0x2ad   :  { %1273 = vst.msk [vmem:[%s1856_s5 + $0x18] sm:$0xf] %vm1272_vm4, %v1424_v19  ;;  %v1224_v22 = vadd.f32 0.5, %v1210_v20 }
 0x2af   :  { %v1428_v5 = vpack.c.bf16 %v1224_v22, %v1224_v22 }
 0x2b0   :  { %v1119_v14 = vpop.f32.mrf.mxu1 }
 0x2b1   :  { %1277 = vst.msk [vmem:[%s1856_s5 + $0x34] sm:$0xf] %vm1272_vm4, %v1428_v5  ;;  %v1120_v58 = vadd.f32 %v1119_v14, %v407_v56 }
 0x2b2   :  { %v1121_v16 = vpop.f32.mrf.mxu1 }
 0x2b3   :  { %v1173_v23 = vmul.f32 0.5, %v1120_v58  ;;  %v1122_v24 = vadd.f32 %v1121_v16, %v411_v9 }
 0x2b4   :  { %v1123_v55 = vpop.f32.mrf.mxu1 }
 0x2b5   :  { %1667 = vtanh.f32 %v1173_v23  ;;  %v1174_v25 = vmul.f32 0.5, %v1122_v24  ;;  %v1124_v26 = vadd.f32 %v1123_v55, %v407_v56 }
 0x2b6   :  { %v1125_v27 = vpop.f32.mrf.mxu1 }
 0x2b7   :  { %1669 = vtanh.f32 %v1174_v25  ;;  %v1180_v28 = vmul.f32 0.5, %v1124_v26  ;;  %v1126_v29 = vadd.f32 %v1125_v27, %v411_v9 }
 0x2b9   :  { %1671 = vtanh.f32 %v1180_v28  ;;  %v1181_v30 = vmul.f32 0.5, %v1126_v29 }
 0x2bb   :  { %1673 = vtanh.f32 %v1181_v30 }
 0x2c2   :  { %v1668_v2 = vpop.eup %1667 }
 0x2c3   :  { %v1201_v31 = vmul.f32 0.5, %v1668_v2 }
 0x2c4   :  { %v1670_v32 = vpop.eup %1669 }
 0x2c5   :  { %v1202_v33 = vmul.f32 0.5, %v1670_v32  ;;  %v1215_v35 = vadd.f32 0.5, %v1201_v31 }
 0x2c6   :  { %v1672_v34 = vpop.eup %1671 }
 0x2c7   :  { %v1216_v36 = vadd.f32 0.5, %v1202_v33  ;;  %v1208_v37 = vmul.f32 0.5, %v1672_v34 }
 0x2c8   :  { %v1674_v38 = vpop.eup %1673 }
 0x2c9   :  { %v1423_v39 = vpack.c.bf16 %v1216_v36, %v1215_v35  ;;  %v1209_v40 = vmul.f32 0.5, %v1674_v38  ;;  %v1222_v41 = vadd.f32 0.5, %v1208_v37 }
 0x2cb   :  { %1271 = vst [vmem:[%s1856_s5 + $0x10] sm:$0xff] %v1423_v39  ;;  %v1223_v42 = vadd.f32 0.5, %v1209_v40 }
 0x2cd   :  { %v1427_v43 = vpack.c.bf16 %v1223_v42, %v1222_v41 }
 0x2cf   :  { %1276 = vst [vmem:[%s1856_s5 + $0x2c] sm:$0xff] %v1427_v43 }
 0x2d0   :  { %1282 = vsyncpa [#allocation3], 1 }
 0x2d1   :  { %1283 = vsyncpa [#allocation5], 1 }

</bundles_post_ra>
